<compile_context>
chip_gen: v5e
topology: v5e:2x2
jax: 0.10.0
libtpu: 0.0.40
codegen_flags: <defaults>
</compile_context>

<pallas_src>
import functools

import jax
import jax.numpy as jnp
from jax.experimental import pallas as pl
from jax.experimental.pallas import tpu as pltpu


NEG_BIG = -1e30  # large finite negative for softmax pad lanes (NOT -inf: avoids NaN)


def actor_critic_kernel(
    x_ref,
    w1_ref, b1_ref,      # fused first layer [actor | critic]: (D, 2H), (1, 2H)
    w2a_ref, b2a_ref,    # actor head, lane-padded:            (H, Wout), (1, Wout)
    w2c_ref, b2c_ref,    # critic second layer:                (H, H), (1, H)
    w3_ref, b3_ref,      # critic value head folded in lane O: (H, Wout), (1, Wout)
    out_ref,             # (bm, Wout): probs in lanes [0, O), value in lane O, 0 elsewhere
):
    H = w2c_ref.shape[0]
    x = x_ref[...]

    # ----- fused first layer (actor | critic): one (bm, D) @ (D, 2H) MXU pass -----
    h = jnp.dot(x, w1_ref[...], preferred_element_type=jnp.float32) + b1_ref[...]
    h = jnp.maximum(h, 0.0)
    h_a = h[:, :H]            # actor hidden  (H is a multiple of 128 -> free vreg split)
    h_c = h[:, H:]            # critic hidden (layer 1)

    # ----- actor head: lane-padded logits -> full-128-lane softmax -----
    # Pad lanes carry logit == -1e30 (zero weight cols + -1e30 bias), so after the
    # max-subtracted exp they are exactly 0 and the sum/normalize is unchanged.
    logits = jnp.dot(h_a, w2a_ref[...], preferred_element_type=jnp.float32) + b2a_ref[...]
    m = jnp.max(logits, axis=-1, keepdims=True)
    e = jnp.exp(logits - m)
    s = jnp.sum(e, axis=-1, keepdims=True)
    # EUP approx reciprocal + 2 Newton steps -> ~f32 accuracy, off the VALU critical path.
    r = pl.reciprocal(s, approx=True)
    r = r * (2.0 - s * r)
    r = r * (2.0 - s * r)
    probs = e * r

    # ----- critic head: Linear -> ReLU -> value via one MXU pass into lane O -----
    h_c2 = jnp.dot(h_c, w2c_ref[...], preferred_element_type=jnp.float32) + b2c_ref[...]
    h_c2 = jnp.maximum(h_c2, 0.0)
    val_slab = jnp.dot(h_c2, w3_ref[...], preferred_element_type=jnp.float32) + b3_ref[...]

    # ----- single lane-dense, unmasked store of the assembled slab -----
    out_ref[...] = probs + val_slab


def _round_up(n, m):
    return ((n + m - 1) // m) * m


def prepare_params(params):
    """One-time weight plumbing (fusion + lane padding). Returns (kernel_args, out_dim)."""
    (w1a, b1a, w2a, b2a, w1c, b1c, w2c, b2c, w3c, b3c) = params
    D, H = w1a.shape
    O = w2a.shape[1]
    # Guard the fused-first-layer split: h[:, :H] / h[:, H:] must land on lane blocks.
    assert H % 128 == 0, f"hidden_layer must be a multiple of 128, got {H}"
    Wout = _round_up(O + 1, 128)   # lane-dense output slab width (probs + value lane)

    # Fuse the two first layers: (D, 2H) weight, (1, 2H) bias.
    w1 = jnp.concatenate([w1a, w1c], axis=1)
    b1 = jnp.concatenate([b1a, b1c], axis=1)

    # Actor head padded to full lane width: zero weight cols, -1e30 bias in pad lanes.
    w2a_p = jnp.zeros((H, Wout), jnp.float32).at[:, :O].set(w2a)
    b2a_p = jnp.full((1, Wout), NEG_BIG, jnp.float32).at[:, :O].set(b2a)

    # Critic value head folded into lane O of a (H, Wout) MXU weight + (1, Wout) bias.
    w3_p = jnp.zeros((H, Wout), jnp.float32).at[:, O].set(w3c[:, 0])
    b3_p = jnp.zeros((1, Wout), jnp.float32).at[0, O].set(b3c[0, 0])

    args = (w1, b1, w2a_p, b2a_p, w2c, b2c, w3_p, b3_p)
    return args, O


def _choose_batch_tiling(B, block_b):
    """Pick (bm, nb): batch tile and number of grid steps.  Padding < one block."""
    if B <= 128:
        return _round_up(B, 8), 1
    if B <= block_b:
        # Force >= 2 grid steps so the "parallel" batch axis is split across the
        # two v7x TensorCores instead of pinning the whole batch to one TC.
        bm = _round_up(-(-B // 2), 8)
        return bm, 2
    bm = _round_up(block_b, 8)
    nb = -(-B // bm)
    return bm, nb


@functools.partial(jax.jit, static_argnames=("out_dim", "block_b"))
def actor_critic_forward(x, prepared, out_dim, block_b=1024):
    """x: (B, D) float32. prepared: output of prepare_params. Returns (probs, value)."""
    (w1, b1, w2a_p, b2a_p, w2c, b2c, w3_p, b3_p) = prepared
    B, D = x.shape
    H = w2c.shape[0]
    Wout = w2a_p.shape[1]
    O = out_dim

    bm, nb = _choose_batch_tiling(B, block_b)
    Bp = bm * nb
    x_p = jnp.pad(x, ((0, Bp - B), (0, 0))) if Bp != B else x

    weight_elems = (D * 2 * H + 2 * H + H * Wout + Wout + H * H + H + H * Wout + Wout)
    cost = pl.CostEstimate(
        flops=2 * Bp * (D * 2 * H + H * Wout + H * H + H * Wout),
        transcendentals=Bp * Wout,
        bytes_accessed=4 * (Bp * D + weight_elems + Bp * Wout),
    )

    args = (x_p, w1, b1, w2a_p, b2a_p, w2c, b2c, w3_p, b3_p)

    if nb == 1:
        # Single block: no grid, no pipeline overhead — everything lives in VMEM.
        out = pl.pallas_call(
            actor_critic_kernel,
            out_shape=jax.ShapeDtypeStruct((Bp, Wout), jnp.float32),
            in_specs=[pl.BlockSpec(memory_space=pltpu.MemorySpace.VMEM) for _ in args],
            out_specs=pl.BlockSpec(memory_space=pltpu.MemorySpace.VMEM),
            cost_estimate=cost,
        )(*args)
    else:
        # Batch-tiled grid: weights use constant index maps so they stay VMEM-resident;
        # the batch axis is "parallel" so v7x's two TensorCores split it.
        out = pl.pallas_call(
            actor_critic_kernel,
            grid=(nb,),
            in_specs=[
                pl.BlockSpec((bm, D), lambda i: (i, 0)),           # x
                pl.BlockSpec((D, 2 * H), lambda i: (0, 0)),        # w1 (fused)
                pl.BlockSpec((1, 2 * H), lambda i: (0, 0)),        # b1 (fused)
                pl.BlockSpec((H, Wout), lambda i: (0, 0)),         # w2a (lane-padded)
                pl.BlockSpec((1, Wout), lambda i: (0, 0)),         # b2a (lane-padded)
                pl.BlockSpec((H, H), lambda i: (0, 0)),            # w2c
                pl.BlockSpec((1, H), lambda i: (0, 0)),            # b2c
                pl.BlockSpec((H, Wout), lambda i: (0, 0)),         # w3 (folded value head)
                pl.BlockSpec((1, Wout), lambda i: (0, 0)),         # b3 (folded bias)
            ],
            out_specs=pl.BlockSpec((bm, Wout), lambda i: (i, 0)),
            out_shape=jax.ShapeDtypeStruct((Bp, Wout), jnp.float32),
            compiler_params=pltpu.CompilerParams(
                dimension_semantics=("parallel",),
            ),
            cost_estimate=cost,
        )(*args)

    probs = out[:B, :O]
    value = out[:B, O:O + 1]
    return probs, value


def init_params(key, input_layer, output_layer, hidden_layer):
    """Deterministic PyTorch-Linear-style init: U(-1/sqrt(fan_in), 1/sqrt(fan_in))."""
    def linear(k, fan_in, fan_out):
        kw, kb = jax.random.split(k)
        bound = 1.0 / jnp.sqrt(jnp.float32(fan_in))
        w = jax.random.uniform(kw, (fan_in, fan_out), jnp.float32, -bound, bound)
        b = jax.random.uniform(kb, (1, fan_out), jnp.float32, -bound, bound)
        return w, b

    k = jax.random.split(key, 5)
    w1a, b1a = linear(k[0], input_layer, hidden_layer)   # actor Linear 1
    w2a, b2a = linear(k[1], hidden_layer, output_layer)  # actor Linear 2
    w1c, b1c = linear(k[2], input_layer, hidden_layer)   # critic Linear 1
    w2c, b2c = linear(k[3], hidden_layer, hidden_layer)  # critic Linear 2
    w3c, b3c = linear(k[4], hidden_layer, 1)             # critic Linear 3
    return (w1a, b1a, w2a, b2a, w1c, b1c, w2c, b2c, w3c, b3c)


def reference_forward(x, params):
    (w1a, b1a, w2a, b2a, w1c, b1c, w2c, b2c, w3c, b3c) = params
    h = jax.nn.relu(x @ w1a + b1a)
    probs = jax.nn.softmax(h @ w2a + b2a, axis=-1)
    h = jax.nn.relu(x @ w1c + b1c)
    h = jax.nn.relu(h @ w2c + b2c)
    value = h @ w3c + b3c
    return probs, value


if __name__ == "__main__":
    D, O, H = 32, 8, 256   # input_layer, output_layer, hidden_layer (module default 256)

    key = jax.random.PRNGKey(0)
    kx1, kx2, kp = jax.random.split(key, 3)
    params = init_params(kp, D, O, H)
    prepared, out_dim = prepare_params(params)
    prepared = jax.block_until_ready(prepared)

    # ---- small batch: single-block (gridless) VMEM path ----
    B = 8
    x = jax.random.normal(kx1, (B, D), jnp.float32)
    probs, value = actor_critic_forward(x, prepared, out_dim)
    probs = jax.block_until_ready(probs)
    value = jax.block_until_ready(value)

    probs_ref, value_ref = reference_forward(x, params)
    assert probs.shape == (B, O) and value.shape == (B, 1)
    assert jnp.allclose(probs, probs_ref, atol=1e-5, rtol=1e-5)
    assert jnp.allclose(value, value_ref, atol=1e-5, rtol=1e-5)
    assert jnp.allclose(jnp.sum(probs, axis=-1), 1.0, atol=1e-5)

    # ---- mid batch (<= block_b): forced 2-step grid (v7x dual-TC path) ----
    B2 = 1000
    x2 = jax.random.normal(kx2, (B2, D), jnp.float32)
    probs2, value2 = actor_critic_forward(x2, prepared, out_dim)
    probs2 = jax.block_until_ready(probs2)
    value2 = jax.block_until_ready(value2)

    probs2_ref, value2_ref = reference_forward(x2, params)
    assert probs2.shape == (B2, O) and value2.shape == (B2, 1)
    assert jnp.allclose(probs2, probs2_ref, atol=2e-5, rtol=2e-5)
    assert jnp.allclose(value2, value2_ref, atol=2e-5, rtol=2e-5)
    assert jnp.allclose(jnp.sum(probs2, axis=-1), 1.0, atol=1e-5)

    # ---- multi-step grid path (B > block_b) with VMEM-resident weights ----
    probs3, value3 = actor_critic_forward(x2, prepared, out_dim, block_b=256)
    probs3 = jax.block_until_ready(probs3)
    value3 = jax.block_until_ready(value3)
    assert jnp.allclose(probs3, probs2_ref, atol=2e-5, rtol=2e-5)
    assert jnp.allclose(value3, value2_ref, atol=2e-5, rtol=2e-5)

    print("KERNEL_OK")
</pallas_src>

<mosaic_0001>
module attributes {stable_mosaic.version = 11 : i64} {
  func.func @actor_critic_kernel(%arg0: memref<8x32xf32, #tpu.memory_space<vmem>>, %arg1: memref<32x512xf32, #tpu.memory_space<vmem>>, %arg2: memref<1x512xf32, #tpu.memory_space<vmem>>, %arg3: memref<256x128xf32, #tpu.memory_space<vmem>>, %arg4: memref<1x128xf32, #tpu.memory_space<vmem>>, %arg5: memref<256x256xf32, #tpu.memory_space<vmem>>, %arg6: memref<1x256xf32, #tpu.memory_space<vmem>>, %arg7: memref<256x128xf32, #tpu.memory_space<vmem>>, %arg8: memref<1x128xf32, #tpu.memory_space<vmem>>, %arg9: memref<8x128xf32, #tpu.memory_space<vmem>>) attributes {dimension_semantics = [], scalar_prefetch = 0 : i64, scratch_operands = 0 : i64, tpu.core_type = #tpu.core_type<tc>} {
    %c0 = arith.constant 0 : index
    %c0_0 = arith.constant 0 : index
    %0 = vector.load %arg0[%c0, %c0_0] : memref<8x32xf32, #tpu.memory_space<vmem>>, vector<8x32xf32>
    %c0_1 = arith.constant 0 : index
    %c0_2 = arith.constant 0 : index
    %1 = vector.load %arg1[%c0_1, %c0_2] : memref<32x512xf32, #tpu.memory_space<vmem>>, vector<32x512xf32>
    %cst = arith.constant dense<0.000000e+00> : vector<8x512xf32>
    %2 = tpu.matmul %0, %1, %cst {dimension_numbers = #tpu.dot_dimension_numbers<[1], [0], [0], [1], [0, 0, 1, 1], [], []>} : vector<8x32xf32>, vector<32x512xf32>, vector<8x512xf32> -> vector<8x512xf32>
    %c0_3 = arith.constant 0 : index
    %c0_4 = arith.constant 0 : index
    %3 = vector.load %arg2[%c0_3, %c0_4] : memref<1x512xf32, #tpu.memory_space<vmem>>, vector<1x512xf32>
    %4 = vector.broadcast %3 : vector<1x512xf32> to vector<8x512xf32>
    %5 = arith.addf %2, %4 : vector<8x512xf32>
    %cst_5 = arith.constant 0.000000e+00 : f32
    %6 = vector.broadcast %cst_5 : f32 to vector<8x512xf32>
    %7 = arith.maximumf %5, %6 : vector<8x512xf32>
    %8 = vector.extract_strided_slice %7 {offsets = [0, 0], sizes = [8, 256], strides = [1, 1]} : vector<8x512xf32> to vector<8x256xf32>
    %9 = vector.extract_strided_slice %7 {offsets = [0, 256], sizes = [8, 256], strides = [1, 1]} : vector<8x512xf32> to vector<8x256xf32>
    %c0_6 = arith.constant 0 : index
    %c0_7 = arith.constant 0 : index
    %10 = vector.load %arg3[%c0_6, %c0_7] : memref<256x128xf32, #tpu.memory_space<vmem>>, vector<256x128xf32>
    %cst_8 = arith.constant dense<0.000000e+00> : vector<8x128xf32>
    %11 = tpu.matmul %8, %10, %cst_8 {dimension_numbers = #tpu.dot_dimension_numbers<[1], [0], [0], [1], [0, 0, 1, 1], [], []>} : vector<8x256xf32>, vector<256x128xf32>, vector<8x128xf32> -> vector<8x128xf32>
    %c0_9 = arith.constant 0 : index
    %c0_10 = arith.constant 0 : index
    %12 = vector.load %arg4[%c0_9, %c0_10] : memref<1x128xf32, #tpu.memory_space<vmem>>, vector<1x128xf32>
    %13 = vector.broadcast %12 : vector<1x128xf32> to vector<8x128xf32>
    %14 = arith.addf %11, %13 : vector<8x128xf32>
    %cst_11 = arith.constant dense<0xFF800000> : vector<8xf32>
    %15 = vector.multi_reduction <maximumf>, %14, %cst_11 [1] : vector<8x128xf32> to vector<8xf32>
    %16 = vector.shape_cast %15 : vector<8xf32> to vector<8x1xf32>
    %17 = vector.broadcast %16 : vector<8x1xf32> to vector<8x128xf32>
    %18 = arith.subf %14, %17 : vector<8x128xf32>
    %19 = math.exp %18 : vector<8x128xf32>
    %cst_12 = arith.constant dense<0.000000e+00> : vector<8xf32>
    %20 = vector.multi_reduction <add>, %19, %cst_12 [1] : vector<8x128xf32> to vector<8xf32>
    %21 = vector.shape_cast %20 : vector<8xf32> to vector<8x1xf32>
    %22 = tpu.reciprocal %21 {approx = true} : vector<8x1xf32> -> vector<8x1xf32>
    %23 = arith.mulf %21, %22 : vector<8x1xf32>
    %cst_13 = arith.constant 2.000000e+00 : f32
    %24 = vector.broadcast %cst_13 : f32 to vector<8x1xf32>
    %25 = arith.subf %24, %23 : vector<8x1xf32>
    %26 = arith.mulf %22, %25 : vector<8x1xf32>
    %27 = arith.mulf %21, %26 : vector<8x1xf32>
    %cst_14 = arith.constant 2.000000e+00 : f32
    %28 = vector.broadcast %cst_14 : f32 to vector<8x1xf32>
    %29 = arith.subf %28, %27 : vector<8x1xf32>
    %30 = arith.mulf %26, %29 : vector<8x1xf32>
    %31 = vector.broadcast %30 : vector<8x1xf32> to vector<8x128xf32>
    %32 = arith.mulf %19, %31 : vector<8x128xf32>
    %c0_15 = arith.constant 0 : index
    %c0_16 = arith.constant 0 : index
    %33 = vector.load %arg5[%c0_15, %c0_16] : memref<256x256xf32, #tpu.memory_space<vmem>>, vector<256x256xf32>
    %cst_17 = arith.constant dense<0.000000e+00> : vector<8x256xf32>
    %34 = tpu.matmul %9, %33, %cst_17 {dimension_numbers = #tpu.dot_dimension_numbers<[1], [0], [0], [1], [0, 0, 1, 1], [], []>} : vector<8x256xf32>, vector<256x256xf32>, vector<8x256xf32> -> vector<8x256xf32>
    %c0_18 = arith.constant 0 : index
    %c0_19 = arith.constant 0 : index
    %35 = vector.load %arg6[%c0_18, %c0_19] : memref<1x256xf32, #tpu.memory_space<vmem>>, vector<1x256xf32>
    %36 = vector.broadcast %35 : vector<1x256xf32> to vector<8x256xf32>
    %37 = arith.addf %34, %36 : vector<8x256xf32>
    %cst_20 = arith.constant 0.000000e+00 : f32
    %38 = vector.broadcast %cst_20 : f32 to vector<8x256xf32>
    %39 = arith.maximumf %37, %38 : vector<8x256xf32>
    %c0_21 = arith.constant 0 : index
    %c0_22 = arith.constant 0 : index
    %40 = vector.load %arg7[%c0_21, %c0_22] : memref<256x128xf32, #tpu.memory_space<vmem>>, vector<256x128xf32>
    %cst_23 = arith.constant dense<0.000000e+00> : vector<8x128xf32>
    %41 = tpu.matmul %39, %40, %cst_23 {dimension_numbers = #tpu.dot_dimension_numbers<[1], [0], [0], [1], [0, 0, 1, 1], [], []>} : vector<8x256xf32>, vector<256x128xf32>, vector<8x128xf32> -> vector<8x128xf32>
    %c0_24 = arith.constant 0 : index
    %c0_25 = arith.constant 0 : index
    %42 = vector.load %arg8[%c0_24, %c0_25] : memref<1x128xf32, #tpu.memory_space<vmem>>, vector<1x128xf32>
    %43 = vector.broadcast %42 : vector<1x128xf32> to vector<8x128xf32>
    %44 = arith.addf %41, %43 : vector<8x128xf32>
    %45 = arith.addf %32, %44 : vector<8x128xf32>
    %c0_26 = arith.constant 0 : index
    %c0_27 = arith.constant 0 : index
    %46 = vector.load %arg9[%c0_26, %c0_27] : memref<8x128xf32, #tpu.memory_space<vmem>>, vector<8x128xf32>
    tpu.vector_store %arg9[%c0_26, %c0_27], %45 {strides = array<i32>} : memref<8x128xf32, #tpu.memory_space<vmem>>, vector<8x128xf32>,
    return
  }
}

</mosaic_0001>

<bundles_post_ra>
// kernel: actor_critic_forward.1
= control target key start
LH: loop header
LB: loop body
LE: loop exit
PB: predicated region body
PF: predicated region fallthrough
CT: control target
= control target key end

     0   :  { %14 = vsyncpa [#allocation3], 0  ;;  %s848_s0 = inlined_call_operand.hbm [shape: f32[8,32], index: 0, kind: input, shape index: {}]   ;;  %s849_s1 = inlined_call_operand.hbm [shape: f32[32,512], index: 1, kind: input, shape index: {}]   ;;  %s850_s2 = inlined_call_operand.hbm [shape: f32[1,512], index: 2, kind: input, shape index: {}]   ;;  %s851_s3 = inlined_call_operand.hbm [shape: f32[256,128], index: 3, kind: input, shape index: {}]   ;;  %s852_s4 = inlined_call_operand.vmem [shape: f32[1,128], index: 4, kind: input, shape index: {}]   ;;  %s853_s5 = inlined_call_operand.hbm [shape: f32[256,256], index: 5, kind: input, shape index: {}]   ;;  %s854_s6 = inlined_call_operand.vmem [shape: f32[1,256], index: 6, kind: input, shape index: {}]   ;;  %s855_s7 = inlined_call_operand.hbm [shape: f32[256,128], index: 7, kind: input, shape index: {}]   ;;  %s856_s8 = inlined_call_operand.vmem [shape: f32[1,128], index: 8, kind: input, shape index: {}]   ;;  %s857_s9 = inlined_call_operand.vmem [shape: f32[8,128], index: 9, kind: output, shape index: {}]  }
   0x1   :  { %15 = vsyncpa [#allocation5], 0 }
   0x2   :  { %16 = vsyncpa [#allocation8], 0  ;;  %s33_s11 = sshll.u32 %s849_s1, 4  ;;  %s34_s11 = int_to_ptr.hbm [resolvable:$true] %s33_s11 }
   0x3   :  { %17 = vsyncpa [#allocation11], 0  ;;  %s740_s12 = smov [#allocation4]   ;;  %s57_s16 = sshll.u32 %s851_s3, 4  ;;  %s58_s16 = int_to_ptr.hbm [resolvable:$true] %s57_s16 }
   0x4   :  { %s35_s13 = sshll.u32 %s740_s12, 4  ;;  %s741_s17 = smov 512   ;;  %s36_s13 = int_to_ptr.vmem [resolvable:$true] %s35_s13 }
   0x5   :  { %s742_s18 = smov 32   ;;  %s743_s19 = smov [#allocation7]  }
   0x6   :  { %41 = dma.hbm_to_vmem [thread:$0]  %s34_s11, 2048, %s36_s13, [#allocation5], %s741_s17, %s741_s17, %s742_s18  }
   0x7   :  { %s59_s20 = sshll.u32 %s743_s19, 4  ;;  %s744_s21 = smov 128   ;;  %s60_s20 = int_to_ptr.vmem [resolvable:$true] %s59_s20 }
   0x8   :  { %s745_s22 = smov 8   ;;  %s23_s24 = sshll.u32 %s848_s0, 4  ;;  %s24_s24 = int_to_ptr.hbm [resolvable:$true] %s23_s24 }
   0x9   :  { %65 = dma.hbm_to_vmem [thread:$0]  %s58_s16, 4096, %s60_s20, [#allocation8], %s744_s21, %s744_s21, %s745_s22  }
   0xa   :  { %s746_s25 = smov [#allocation2]   ;;  %s47_s28 = sshll.u32 %s850_s2, 4  ;;  %s48_s28 = int_to_ptr.hbm [resolvable:$true] %s47_s28 }
   0xb   :  { %s25_s3 = sshll.u32 %s746_s25, 4  ;;  %s747_s29 = smov [#allocation6]   ;;  %s26_s3 = int_to_ptr.vmem [resolvable:$true] %s25_s3 }
   0xc   :  { %28 = dma.hbm_to_vmem [thread:$0]  %s24_s24, 128, %s26_s3, [#allocation3]  }
   0xd   :  { %s49_s30 = sshll.u32 %s747_s29, 4  ;;  %s72_s12 = sshll.u32 %s853_s5, 4  ;;  %s50_s30 = int_to_ptr.vmem [resolvable:$true] %s49_s30  ;;  %s73_s12 = int_to_ptr.hbm [resolvable:$true] %s72_s12 }
   0xe   :  { %52 = dma.hbm_to_vmem [thread:$0]  %s48_s28, 64, %s50_s30, [#allocation5]  }
   0xf   :  { %s748_s0 = smov [#allocation9]   ;;  %s87_s16 = sshll.u32 %s855_s7, 4  ;;  %s88_s16 = int_to_ptr.hbm [resolvable:$true] %s87_s16 }
  0x10   :  { %s74_s13 = sshll.u32 %s748_s0, 4  ;;  %s749_s17 = smov 256   ;;  %s75_s13 = int_to_ptr.vmem [resolvable:$true] %s74_s13 }
  0x11   :  { %s750_s2 = smov 16   ;;  %s751_s18 = smov [#allocation10]  }
  0x12   :  { %80 = dma.hbm_to_vmem [thread:$0]  %s73_s12, 8192, %s75_s13, [#allocation8], %s749_s17, %s749_s17, %s750_s2  }
  0x13   :  { %s89_s19 = sshll.u32 %s751_s18, 4  ;;  %s90_s19 = int_to_ptr.vmem [resolvable:$true] %s89_s19 }
  0x14   :  { %95 = dma.hbm_to_vmem [thread:$0]  %s88_s16, 4096, %s90_s19, [#allocation11], %s744_s21, %s744_s21, %s745_s22  }
  0x15   :  { %732 = dma.done.wait [#allocation3], 128  }
  0x16   :  { %733 = vsyncadd [#allocation3], 4294967168 }
  0x17   :  { %734 = dma.done.wait [#allocation5], 2112  }
  0x18   :  { %735 = vsyncadd [#allocation5], 4294965184 }
  0x19   :  { %736 = dma.done.wait [#allocation8], 12288  }
  0x1a   :  { %737 = vsyncadd [#allocation8], 4294955008 }
  0x1b   :  { %738 = dma.done.wait [#allocation11], 4096  }
  0x1c   :  { %739 = vsyncadd [#allocation11], 4294963200  ;;  %v135_v0 = vld [vmem:[#allocation4 + $0x60] sm:$0xff]  ;;  %v136_v2 = vld [vmem:[#allocation4 + $0x68] sm:$0xff]  ;;  %vm149_vm0 = vcmask 261120  }
  0x1d   :  { %v131_v1 = vld [vmem:[#allocation4 + $0x40] sm:$0xff]  ;;  %165 = vmatpush.msra.mxu0 %v135_v0  ;;  %185 = vmatpush.msra.mxu1 %v136_v2  ;;  %v132_v3 = vld [vmem:[#allocation4 + $0x48] sm:$0xff]  ;;  %v137_v6 = vld [vmem:[#allocation4 + $0x70] sm:$0xff] }
  0x1e   :  { %v127_v4 = vld [vmem:[#allocation4 + $0x20] sm:$0xff]  ;;  %v128_v5 = vld [vmem:[#allocation4 + $0x28] sm:$0xff]  ;;  %v133_v7 = vld [vmem:[#allocation4 + $0x50] sm:$0xff]  ;;  %205 = vmatpush.msra.mxu2 %v137_v6 }
  0x1f   :  { %166 = vmatpush.msra.mxu0 %v131_v1  ;;  %186 = vmatpush.msra.mxu1 %v132_v3  ;;  %v123_v8 = vld [vmem:[#allocation4] sm:$0xff]  ;;  %v124_v9 = vld [vmem:[#allocation4 + $0x8] sm:$0xff]  ;;  %v138_v10 = vld [vmem:[#allocation4 + $0x78] sm:$0xff] }
  0x20   :  { %v122_v11 = vld [vmem:[#allocation2] sm:$0xff]  ;;  %206 = vmatpush.msra.mxu2 %v133_v7  ;;  %225 = vmatpush.msra.mxu3 %v138_v10  ;;  %v129_v14 = vld [vmem:[#allocation4 + $0x30] sm:$0xff]  ;;  %v249_v23 = vld [vmem:[#allocation7 + $0x60] sm:$0xff] }
  0x21   :  { %167 = vmatpush.msra.mxu0 %v127_v4  ;;  %187 = vmatpush.msra.mxu1 %v128_v5  ;;  %v252_v12 = vld [vmem:[#allocation7 + $0x78] sm:$0xff]  ;;  %v251_v16 = vld [vmem:[#allocation7 + $0x70] sm:$0xff]  ;;  %v250_v20 = vld [vmem:[#allocation7 + $0x68] sm:$0xff] }
  0x22   :  { %v268_v13 = vld [vmem:[#allocation7 + $0xf8] sm:$0xff]  ;;  %v267_v17 = vld [vmem:[#allocation7 + $0xf0] sm:$0xff]  ;;  %207 = vmatpush.msra.mxu2 %v129_v14  ;;  %v266_v21 = vld [vmem:[#allocation7 + $0xe8] sm:$0xff] }
  0x23   :  { %168 = vmatpush.msra.mxu0 %v123_v8  ;;  %188 = vmatpush.msra.mxu1 %v124_v9  ;;  %v134_v15 = vld [vmem:[#allocation4 + $0x58] sm:$0xff]  ;;  %v125_v18 = vld [vmem:[#allocation4 + $0x10] sm:$0xff]  ;;  %v265_v24 = vld [vmem:[#allocation7 + $0xe0] sm:$0xff] }
  0x24   :  { %566 = vmatmul.msk.f32.vlgmr.msra.gmra.mxu0 %vm149_vm0, %v122_v11  ;;  %567 = vmatmul.msk.f32.vlgmr.msra.gmra.mxu1 %vm149_vm0, %v122_v11  ;;  %v130_v19 = vld [vmem:[#allocation4 + $0x38] sm:$0xff]  ;;  %v246_v29 = vld [vmem:[#allocation7 + $0x48] sm:$0xff]  ;;  %v245_v31 = vld [vmem:[#allocation7 + $0x40] sm:$0xff] }
  0x25   :  { %273 = vmatpush.msrb.mxu0 %v252_v12  ;;  %293 = vmatpush.msrb.mxu1 %v268_v13  ;;  %v126_v22 = vld [vmem:[#allocation4 + $0x18] sm:$0xff]  ;;  %v262_v30 = vld [vmem:[#allocation7 + $0xc8] sm:$0xff]  ;;  %v261_v32 = vld [vmem:[#allocation7 + $0xc0] sm:$0xff] }
  0x26   :  { %226 = vmatpush.msra.mxu3 %v134_v15  ;;  %208 = vmatpush.msra.mxu2 %v125_v18  ;;  %v248_v25 = vld [vmem:[#allocation7 + $0x58] sm:$0xff]  ;;  %v247_v27 = vld [vmem:[#allocation7 + $0x50] sm:$0xff]  ;;  %v242_v37 = vld [vmem:[#allocation7 + $0x28] sm:$0xff] }
  0x27   :  { %274 = vmatpush.msrb.mxu0 %v251_v16  ;;  %294 = vmatpush.msrb.mxu1 %v267_v17  ;;  %v264_v26 = vld [vmem:[#allocation7 + $0xd8] sm:$0xff]  ;;  %v263_v28 = vld [vmem:[#allocation7 + $0xd0] sm:$0xff]  ;;  %v258_v38 = vld [vmem:[#allocation7 + $0xa8] sm:$0xff] }
  0x28   :  { %227 = vmatpush.msra.mxu3 %v130_v19  ;;  %568 = vmatmul.msk.f32.vlgmr.msra.gmra.mxu2 %vm149_vm0, %v122_v11  ;;  %v244_v33 = vld [vmem:[#allocation7 + $0x38] sm:$0xff]  ;;  %v243_v35 = vld [vmem:[#allocation7 + $0x30] sm:$0xff]  ;;  %v241_v39 = vld [vmem:[#allocation7 + $0x20] sm:$0xff] }
  0x29   :  { %275 = vmatpush.msrb.mxu0 %v250_v20  ;;  %295 = vmatpush.msrb.mxu1 %v266_v21  ;;  %v260_v34 = vld [vmem:[#allocation7 + $0xb8] sm:$0xff]  ;;  %v259_v36 = vld [vmem:[#allocation7 + $0xb0] sm:$0xff]  ;;  %v257_v40 = vld [vmem:[#allocation7 + $0xa0] sm:$0xff] }
  0x2a   :  { %228 = vmatpush.msra.mxu3 %v126_v22  ;;  %v240_v41 = vld [vmem:[#allocation7 + $0x18] sm:$0xff]  ;;  %v239_v42 = vld [vmem:[#allocation7 + $0x10] sm:$0xff]  ;;  %v238_v44 = vld [vmem:[#allocation7 + $0x8] sm:$0xff] }
  0x2b   :  { %276 = vmatpush.msrb.mxu0 %v249_v23  ;;  %296 = vmatpush.msrb.mxu1 %v265_v24  ;;  %v256_v43 = vld [vmem:[#allocation7 + $0x98] sm:$0xff]  ;;  %v255_v45 = vld [vmem:[#allocation7 + $0x90] sm:$0xff]  ;;  %v237_v46 = vld [vmem:[#allocation7] sm:$0xff] }
  0x2c   :  { %569 = vmatmul.msk.f32.vlgmr.msra.gmra.mxu3 %vm149_vm0, %v122_v11  ;;  %v254_v47 = vld [vmem:[#allocation7 + $0x88] sm:$0xff]  ;;  %v253_v48 = vld [vmem:[#allocation7 + $0x80] sm:$0xff]  ;;  %v358_v49 = vld [vmem:[#allocation9 + $0xf0] sm:$0xff] }
  0x2d   :  { %277 = vmatpush.msrb.mxu0 %v248_v25  ;;  %297 = vmatpush.msrb.mxu1 %v264_v26  ;;  %v356_v50 = vld [vmem:[#allocation9 + $0xe0] sm:$0xff]  ;;  %v390_v51 = vld [vmem:[#allocation9 + $0x1f0] sm:$0xff]  ;;  %v359_v55 = vld [vmem:[#allocation9 + $0xf8] sm:$0xff] }
  0x2e   :  { %398 = vmatpush.msrb.mxu2 %v358_v49  ;;  %v388_v52 = vld [vmem:[#allocation9 + $0x1e0] sm:$0xff]  ;;  %418 = vmatpush.msrb.mxu3 %v390_v51  ;;  %v354_v53 = vld [vmem:[#allocation9 + $0xd0] sm:$0xff]  ;;  %v357_v57 = vld [vmem:[#allocation9 + $0xe8] sm:$0xff] }
  0x2f   :  { %278 = vmatpush.msrb.mxu0 %v247_v27  ;;  %298 = vmatpush.msrb.mxu1 %v263_v28  ;;  %v386_v54 = vld [vmem:[#allocation9 + $0x1d0] sm:$0xff]  ;;  %v352_v56 = vld [vmem:[#allocation9 + $0xc0] sm:$0xff]  ;;  %v391_v58 = vld [vmem:[#allocation9 + $0x1f8] sm:$0xff] }
  0x30   :  { %399 = vmatpush.msrb.mxu2 %v356_v50  ;;  %419 = vmatpush.msrb.mxu3 %v388_v52  ;;  %v384_v59 = vld [vmem:[#allocation9 + $0x1c0] sm:$0xff]  ;;  %v355_v60 = vld [vmem:[#allocation9 + $0xd8] sm:$0xff]  ;;  %v350_v61 = vld [vmem:[#allocation9 + $0xb0] sm:$0xff] }
  0x31   :  { %279 = vmatpush.msrb.mxu0 %v246_v29  ;;  %299 = vmatpush.msrb.mxu1 %v262_v30  ;;  %v389_v62 = vld [vmem:[#allocation9 + $0x1e8] sm:$0xff]  ;;  %v382_v63 = vld [vmem:[#allocation9 + $0x1b0] sm:$0xff]  ;;  %v387_v1 = vld [vmem:[#allocation9 + $0x1d8] sm:$0xff] }
  0x32   :  { %400 = vmatpush.msrb.mxu2 %v354_v53  ;;  %420 = vmatpush.msrb.mxu3 %v386_v54  ;;  %v353_v0 = vld [vmem:[#allocation9 + $0xc8] sm:$0xff]  ;;  %v348_v2 = vld [vmem:[#allocation9 + $0xa0] sm:$0xff]  ;;  %v351_v5 = vld [vmem:[#allocation9 + $0xb8] sm:$0xff] }
  0x33   :  { %280 = vmatpush.msrb.mxu0 %v245_v31  ;;  %300 = vmatpush.msrb.mxu1 %v261_v32  ;;  %v385_v3 = vld [vmem:[#allocation9 + $0x1c8] sm:$0xff]  ;;  %v380_v4 = vld [vmem:[#allocation9 + $0x1a0] sm:$0xff]  ;;  %v346_v6 = vld [vmem:[#allocation9 + $0x90] sm:$0xff] }
  0x34   :  { %401 = vmatpush.msrb.mxu2 %v352_v56  ;;  %421 = vmatpush.msrb.mxu3 %v384_v59  ;;  %v383_v7 = vld [vmem:[#allocation9 + $0x1b8] sm:$0xff]  ;;  %v378_v8 = vld [vmem:[#allocation9 + $0x190] sm:$0xff]  ;;  %v349_v9 = vld [vmem:[#allocation9 + $0xa8] sm:$0xff] }
  0x35   :  { %281 = vmatpush.msrb.mxu0 %v244_v33  ;;  %301 = vmatpush.msrb.mxu1 %v260_v34  ;;  %v344_v10 = vld [vmem:[#allocation9 + $0x80] sm:$0xff]  ;;  %v381_v11 = vld [vmem:[#allocation9 + $0x1a8] sm:$0xff]  ;;  %v347_v13 = vld [vmem:[#allocation9 + $0x98] sm:$0xff] }
  0x36   :  { %402 = vmatpush.msrb.mxu2 %v350_v61  ;;  %422 = vmatpush.msrb.mxu3 %v382_v63  ;;  %v376_v12 = vld [vmem:[#allocation9 + $0x180] sm:$0xff]  ;;  %v342_v14 = vld [vmem:[#allocation9 + $0x70] sm:$0xff]  ;;  %v379_v15 = vld [vmem:[#allocation9 + $0x198] sm:$0xff] }
  0x37   :  { %282 = vmatpush.msrb.mxu0 %v243_v35  ;;  %302 = vmatpush.msrb.mxu1 %v259_v36  ;;  %v374_v16 = vld [vmem:[#allocation9 + $0x170] sm:$0xff]  ;;  %v345_v17 = vld [vmem:[#allocation9 + $0x88] sm:$0xff]  ;;  %v340_v18 = vld [vmem:[#allocation9 + $0x60] sm:$0xff] }
  0x38   :  { %403 = vmatpush.msrb.mxu2 %v348_v2  ;;  %423 = vmatpush.msrb.mxu3 %v380_v4  ;;  %v377_v19 = vld [vmem:[#allocation9 + $0x188] sm:$0xff]  ;;  %v372_v20 = vld [vmem:[#allocation9 + $0x160] sm:$0xff]  ;;  %v343_v21 = vld [vmem:[#allocation9 + $0x78] sm:$0xff] }
  0x39   :  { %283 = vmatpush.msrb.mxu0 %v242_v37  ;;  %303 = vmatpush.msrb.mxu1 %v258_v38  ;;  %v338_v22 = vld [vmem:[#allocation9 + $0x50] sm:$0xff]  ;;  %v375_v23 = vld [vmem:[#allocation9 + $0x178] sm:$0xff]  ;;  %v341_v25 = vld [vmem:[#allocation9 + $0x68] sm:$0xff] }
  0x3a   :  { %404 = vmatpush.msrb.mxu2 %v346_v6  ;;  %424 = vmatpush.msrb.mxu3 %v378_v8  ;;  %v370_v24 = vld [vmem:[#allocation9 + $0x150] sm:$0xff]  ;;  %v336_v26 = vld [vmem:[#allocation9 + $0x40] sm:$0xff]  ;;  %v373_v27 = vld [vmem:[#allocation9 + $0x168] sm:$0xff] }
  0x3b   :  { %284 = vmatpush.msrb.mxu0 %v241_v39  ;;  %304 = vmatpush.msrb.mxu1 %v257_v40  ;;  %v830_v28 = vld [vmem:[#allocation6] sm:$0xf]  ;;  %v368_v29 = vld [vmem:[#allocation9 + $0x140] sm:$0xff]  ;;  %v334_v31 = vld [vmem:[#allocation9 + $0x30] sm:$0xff] }
  0x3c   :  { %405 = vmatpush.msrb.mxu2 %v344_v10  ;;  %425 = vmatpush.msrb.mxu3 %v376_v12  ;;  %v339_v30 = vld [vmem:[#allocation9 + $0x58] sm:$0xff]  ;;  %v366_v33 = vld [vmem:[#allocation9 + $0x130] sm:$0xff]  ;;  %v337_v34 = vld [vmem:[#allocation9 + $0x48] sm:$0xff]  ;;  %v141_v35 = vperm.slane %v830_v28, 0  ;;  %v142_v36 = vperm.slane %v830_v28, 1  ;;  %v144_v59 = vperm.slane %v830_v28, 3 }
  0x3d   :  { %285 = vmatpush.msrb.mxu0 %v240_v41  ;;  %305 = vmatpush.msrb.mxu1 %v256_v43  ;;  %v371_v32 = vld [vmem:[#allocation9 + $0x158] sm:$0xff]  ;;  %v332_v37 = vld [vmem:[#allocation9 + $0x20] sm:$0xff]  ;;  %v369_v38 = vld [vmem:[#allocation9 + $0x148] sm:$0xff] }
  0x3e   :  { %406 = vmatpush.msrb.mxu2 %v342_v14  ;;  %426 = vmatpush.msrb.mxu3 %v374_v16  ;;  %v364_v39 = vld [vmem:[#allocation9 + $0x120] sm:$0xff]  ;;  %v335_v40 = vld [vmem:[#allocation9 + $0x38] sm:$0xff]  ;;  %v330_v41 = vld [vmem:[#allocation9 + $0x10] sm:$0xff] }
  0x3f   :  { %286 = vmatpush.msrb.mxu0 %v239_v42  ;;  %306 = vmatpush.msrb.mxu1 %v255_v45  ;;  %v367_v42 = vld [vmem:[#allocation9 + $0x138] sm:$0xff]  ;;  %v362_v45 = vld [vmem:[#allocation9 + $0x110] sm:$0xff]  ;;  %v328_v49 = vld [vmem:[#allocation9] sm:$0xff] }
  0x40   :  { %407 = vmatpush.msrb.mxu2 %v340_v18  ;;  %427 = vmatpush.msrb.mxu3 %v372_v20  ;;  %v365_v50 = vld [vmem:[#allocation9 + $0x128] sm:$0xff]  ;;  %v360_v53 = vld [vmem:[#allocation9 + $0x100] sm:$0xff]  ;;  %v331_v54 = vld [vmem:[#allocation9 + $0x18] sm:$0xff] }
  0x41   :  { %287 = vmatpush.msrb.mxu0 %v238_v44  ;;  %307 = vmatpush.msrb.mxu1 %v254_v47  ;;  %v329_v56 = vld [vmem:[#allocation9 + $0x8] sm:$0xff]  ;;  %v495_v2 = vld [vmem:[#allocation10 + $0x78] sm:$0xff]  ;;  %v492_v8 = vld [vmem:[#allocation10 + $0x60] sm:$0xff] }
  0x42   :  { %408 = vmatpush.msrb.mxu2 %v338_v22  ;;  %428 = vmatpush.msrb.mxu3 %v370_v24  ;;  %v511_v4 = vld [vmem:[#allocation10 + $0xf8] sm:$0xff]  ;;  %v493_v6 = vld [vmem:[#allocation10 + $0x68] sm:$0xff]  ;;  %v490_v12 = vld [vmem:[#allocation10 + $0x50] sm:$0xff] }
  0x43   :  { %288 = vmatpush.msrb.mxu0 %v237_v46  ;;  %308 = vmatpush.msrb.mxu1 %v253_v48  ;;  %v333_v46 = vld [vmem:[#allocation9 + $0x28] sm:$0xff]  ;;  %v491_v10 = vld [vmem:[#allocation10 + $0x58] sm:$0xff]  ;;  %v488_v16 = vld [vmem:[#allocation10 + $0x40] sm:$0xff] }
  0x44   :  { %409 = vmatpush.msrb.mxu2 %v336_v26  ;;  %429 = vmatpush.msrb.mxu3 %v368_v29  ;;  %v489_v14 = vld [vmem:[#allocation10 + $0x48] sm:$0xff]  ;;  %v487_v18 = vld [vmem:[#allocation10 + $0x38] sm:$0xff]  ;;  %v486_v20 = vld [vmem:[#allocation10 + $0x30] sm:$0xff] }
  0x45   :  { %438 = vmatpush.msra.mxu0 %v359_v55  ;;  %458 = vmatpush.msra.mxu1 %v391_v58  ;;  %v363_v55 = vld [vmem:[#allocation9 + $0x118] sm:$0xff]  ;;  %v143_v58 = vperm.slane %v830_v28, 2  ;;  %v485_v22 = vld [vmem:[#allocation10 + $0x28] sm:$0xff]  ;;  %v484_v24 = vld [vmem:[#allocation10 + $0x20] sm:$0xff] }
  0x46   :  { %410 = vmatpush.msrb.mxu2 %v334_v31  ;;  %430 = vmatpush.msrb.mxu3 %v366_v33  ;;  %v483_v26 = vld [vmem:[#allocation10 + $0x18] sm:$0xff]  ;;  %v582_v28 = vld [vmem:[%s852_s4] ss:$0 sm:$0xff] }
  0x47   :  { %439 = vmatpush.msra.mxu0 %v357_v57  ;;  %459 = vmatpush.msra.mxu1 %v389_v62  ;;  %v361_v57 = vld [vmem:[#allocation9 + $0x108] sm:$0xff]  ;;  %v482_v29 = vld [vmem:[#allocation10 + $0x10] sm:$0xff] }
  0x48   :  { %411 = vmatpush.msrb.mxu2 %v332_v37  ;;  %431 = vmatpush.msrb.mxu3 %v364_v39 }
  0x49   :  { %440 = vmatpush.msra.mxu0 %v355_v60  ;;  %460 = vmatpush.msra.mxu1 %v387_v1 }
  0x4a   :  { %412 = vmatpush.msrb.mxu2 %v330_v41  ;;  %432 = vmatpush.msrb.mxu3 %v362_v45  ;;  %v498_v45 = vld [vmem:[#allocation10 + $0x90] sm:$0xff] }
  0x4b   :  { %441 = vmatpush.msra.mxu0 %v353_v0  ;;  %461 = vmatpush.msra.mxu1 %v385_v3  ;;  %v494_v3 = vld [vmem:[#allocation10 + $0x70] sm:$0xff] }
  0x4c   :  { %413 = vmatpush.msrb.mxu2 %v328_v49  ;;  %433 = vmatpush.msrb.mxu3 %v360_v53  ;;  %v497_v49 = vld [vmem:[#allocation10 + $0x88] sm:$0xff] }
  0x4d   :  { %442 = vmatpush.msra.mxu0 %v351_v5  ;;  %462 = vmatpush.msra.mxu1 %v383_v7  ;;  %v510_v5 = vld [vmem:[#allocation10 + $0xf0] sm:$0xff]  ;;  %v509_v7 = vld [vmem:[#allocation10 + $0xe8] sm:$0xff] }
  0x4e   :  { %516 = vmatpush.msra.mxu2 %v495_v2  ;;  %536 = vmatpush.msra.mxu3 %v511_v4 }
  0x4f   :  { %443 = vmatpush.msra.mxu0 %v349_v9  ;;  %463 = vmatpush.msra.mxu1 %v381_v11  ;;  %v508_v9 = vld [vmem:[#allocation10 + $0xe0] sm:$0xff]  ;;  %v507_v11 = vld [vmem:[#allocation10 + $0xd8] sm:$0xff] }
  0x50   :  { %517 = vmatpush.msra.mxu2 %v494_v3  ;;  %537 = vmatpush.msra.mxu3 %v510_v5 }
  0x51   :  { %444 = vmatpush.msra.mxu0 %v347_v13  ;;  %464 = vmatpush.msra.mxu1 %v379_v15  ;;  %v506_v13 = vld [vmem:[#allocation10 + $0xd0] sm:$0xff]  ;;  %v505_v15 = vld [vmem:[#allocation10 + $0xc8] sm:$0xff] }
  0x52   :  { %518 = vmatpush.msra.mxu2 %v493_v6  ;;  %538 = vmatpush.msra.mxu3 %v509_v7 }
  0x53   :  { %445 = vmatpush.msra.mxu0 %v345_v17  ;;  %465 = vmatpush.msra.mxu1 %v377_v19  ;;  %v504_v17 = vld [vmem:[#allocation10 + $0xc0] sm:$0xff]  ;;  %v503_v19 = vld [vmem:[#allocation10 + $0xb8] sm:$0xff] }
  0x54   :  { %519 = vmatpush.msra.mxu2 %v492_v8  ;;  %539 = vmatpush.msra.mxu3 %v508_v9 }
  0x55   :  { %446 = vmatpush.msra.mxu0 %v343_v21  ;;  %466 = vmatpush.msra.mxu1 %v375_v23  ;;  %v502_v21 = vld [vmem:[#allocation10 + $0xb0] sm:$0xff]  ;;  %v501_v23 = vld [vmem:[#allocation10 + $0xa8] sm:$0xff] }
  0x56   :  { %520 = vmatpush.msra.mxu2 %v491_v10  ;;  %540 = vmatpush.msra.mxu3 %v507_v11 }
  0x57   :  { %447 = vmatpush.msra.mxu0 %v341_v25  ;;  %467 = vmatpush.msra.mxu1 %v373_v27  ;;  %v500_v25 = vld [vmem:[#allocation10 + $0xa0] sm:$0xff]  ;;  %v499_v27 = vld [vmem:[#allocation10 + $0x98] sm:$0xff] }
  0x58   :  { %521 = vmatpush.msra.mxu2 %v490_v12  ;;  %541 = vmatpush.msra.mxu3 %v506_v13 }
  0x59   :  { %448 = vmatpush.msra.mxu0 %v339_v30  ;;  %468 = vmatpush.msra.mxu1 %v371_v32 }
  0x5a   :  { %522 = vmatpush.msra.mxu2 %v489_v14  ;;  %542 = vmatpush.msra.mxu3 %v505_v15 }
  0x5b   :  { %449 = vmatpush.msra.mxu0 %v337_v34  ;;  %469 = vmatpush.msra.mxu1 %v369_v38  ;;  %v392_v34 = vld [vmem:[%s854_s6] sm:$0x3] }
  0x5c   :  { %523 = vmatpush.msra.mxu2 %v488_v16  ;;  %543 = vmatpush.msra.mxu3 %v504_v17  ;;  %v395_v39 = vperm.slane %v392_v34, 1 }
  0x5d   :  { %450 = vmatpush.msra.mxu0 %v335_v40  ;;  %470 = vmatpush.msra.mxu1 %v367_v42 }
  0x5e   :  { %524 = vmatpush.msra.mxu2 %v487_v18  ;;  %544 = vmatpush.msra.mxu3 %v503_v19 }
  0x5f   :  { %451 = vmatpush.msra.mxu0 %v333_v46  ;;  %471 = vmatpush.msra.mxu1 %v365_v50 }
  0x60   :  { %525 = vmatpush.msra.mxu2 %v486_v20  ;;  %545 = vmatpush.msra.mxu3 %v502_v21 }
  0x61   :  { %452 = vmatpush.msra.mxu0 %v331_v54  ;;  %472 = vmatpush.msra.mxu1 %v363_v55 }
  0x62   :  { %526 = vmatpush.msra.mxu2 %v485_v22  ;;  %546 = vmatpush.msra.mxu3 %v501_v23 }
  0x63   :  { %453 = vmatpush.msra.mxu0 %v329_v56  ;;  %473 = vmatpush.msra.mxu1 %v361_v57 }
  0x64   :  { %527 = vmatpush.msra.mxu2 %v484_v24  ;;  %547 = vmatpush.msra.mxu3 %v500_v25 }
  0x66   :  { %528 = vmatpush.msra.mxu2 %v483_v26  ;;  %548 = vmatpush.msra.mxu3 %v499_v27 }
  0x68   :  { %529 = vmatpush.msra.mxu2 %v482_v29  ;;  %549 = vmatpush.msra.mxu3 %v498_v45 }
  0x6a   :  { %550 = vmatpush.msra.mxu3 %v497_v49 }
  0xa1   :  { %v170_v43 = vpop.f32.mrf.mxu0  ;;  %v190_v44 = vpop.f32.mrf.mxu1 }
  0xa2   :  { %v171_v47 = vadd.f32 %v170_v43, %v141_v35  ;;  %v191_v48 = vadd.f32 %v190_v44, %v142_v36  ;;  %v394_v35 = vperm.slane %v392_v34, 0  ;;  %v481_v44 = vld [vmem:[#allocation10 + $0x8] sm:$0xff] }
  0xa3   :  { %530 = vmatpush.msra.mxu2 %v481_v44 }
  0xa4   :  { %v233_v51 = vmax.f32 %v171_v47, 0.0  ;;  %v234_v52 = vmax.f32 %v191_v48, 0.0  ;;  %v480_v48 = vld [vmem:[#allocation10] sm:$0xff] }
  0xa5   :  { %531 = vmatpush.msra.mxu2 %v480_v48 }
  0xa6   :  { %289 = vmatmul.f32.vlgmr.msrb.gmra.mxu0 %v233_v51  ;;  %309 = vmatmul.f32.vlgmr.msrb.gmra.mxu1 %v234_v52  ;;  %v496_v51 = vld [vmem:[#allocation10 + $0x80] sm:$0xff] }
  0xa7   :  { %551 = vmatpush.msra.mxu3 %v496_v51 }
  0xab   :  { %v210_v60 = vpop.f32.mrf.mxu2 }
  0xac   :  { %v211_v61 = vadd.f32 %v210_v60, %v143_v58 }
  0xae   :  { %v235_v63 = vmax.f32 %v211_v61, 0.0  ;;  %v583_v61 = vld [vmem:[%s856_s8] ss:$0 sm:$0xff] }
  0xaf   :  { %v230_v62 = vpop.f32.mrf.mxu3 }
  0xb0   :  { %v231_v0 = vadd.f32 %v230_v62, %v144_v59  ;;  %414 = vmatmul.f32.vlgmr.msrb.gmra.mxu2 %v235_v63  ;;  %454 = vmatmul.f32.vlgmr.msra.gmra.mxu0 %v235_v63 }
  0xb2   :  { %v236_v1 = vmax.f32 %v231_v0, 0.0 }
  0xb4   :  { %434 = vmatmul.f32.vlgmr.msrb.gmra.mxu3 %v236_v1  ;;  %474 = vmatmul.f32.vlgmr.msra.gmra.mxu1 %v236_v1 }
 0x123   :  { %v290_v30 = vpop.f32.mrf.mxu0  ;;  %v310_v31 = vpop.f32.mrf.mxu1 }
 0x124   :  { %v291_v32 = vadd.f32 %v582_v28, %v290_v30 }
 0x126   :  { %v311_v33 = vadd.f32 %v310_v31, %v291_v32 }
 0x128   :  { %313 = vmax.xlane.f32.xlu0 %v311_v33 }
 0x12d   :  { %v455_v40 = vpop.f32.mrf.mxu0 }
 0x12e   :  { %v456_v42 = vadd.f32 %v455_v40, %v395_v39 }
 0x131   :  { %v475_v46 = vpop.f32.mrf.mxu1 }
 0x132   :  { %v476_v47 = vadd.f32 %v475_v46, %v456_v42 }
 0x133   :  { %v415_v36 = vpop.f32.mrf.mxu2 }
 0x134   :  { %v416_v37 = vadd.f32 %v415_v36, %v394_v35  ;;  %v479_v50 = vmax.f32 %v476_v47, 0.0 }
 0x136   :  { %552 = vmatmul.f32.vlgmr.msra.gmra.mxu3 %v479_v50 }
 0x137   :  { %v435_v38 = vpop.f32.mrf.mxu3 }
 0x138   :  { %v436_v41 = vadd.f32 %v435_v38, %v416_v37 }
 0x13a   :  { %v478_v43 = vmax.f32 %v436_v41, 0.0 }
 0x13c   :  { %532 = vmatmul.f32.vlgmr.msra.gmra.mxu2 %v478_v43 }
 0x19b   :  { %v314_v52 = vpop.xlane.xlu0 %313 }
 0x19c   :  { %v315_v53 = vsub.f32 %v311_v33, %v314_v52 }
 0x19e   :  { %v316_v54 = vmul.f32 1.442695, %v315_v53 }
 0x1a0   :  { %584 = vpow2.f32 %v316_v54 }
 0x1a6   :  { %v585_v55 = vpop.eup %584 }
 0x1a7   :  { %318 = vadd.xlane.f32.xlu0 %v585_v55 }
 0x1b9   :  { %v553_v2 = vpop.f32.mrf.mxu3 }
 0x1bf   :  { %v533_v62 = vpop.f32.mrf.mxu2 }
 0x1c0   :  { %v534_v1 = vadd.f32 %v583_v61, %v533_v62 }
 0x1c2   :  { %v554_v5 = vadd.f32 %v553_v2, %v534_v1 }
 0x21a   :  { %v319_v56 = vpop.xlane.xlu0 %318 }
 0x21b   :  { %586 = vrcp.f32 %v319_v56 }
 0x221   :  { %v587_v57 = vpop.eup %586 }
 0x222   :  { %v321_v58 = vmul.f32 %v587_v57, %v319_v56 }
 0x224   :  { %v322_v59 = vsub.f32 2.0, %v321_v58 }
 0x226   :  { %v323_v60 = vmul.f32 %v587_v57, %v322_v59 }
 0x228   :  { %v324_v63 = vmul.f32 %v323_v60, %v319_v56 }
 0x22a   :  { %v325_v0 = vsub.f32 2.0, %v324_v63 }
 0x22c   :  { %v326_v3 = vmul.f32 %v325_v0, %v323_v60 }
 0x22e   :  { %v327_v4 = vmul.f32 %v585_v55, %v326_v3 }
 0x230   :  { %v556_v6 = vadd.f32 %v554_v5, %v327_v4 }
 0x232   :  { %557 = vst [vmem:[%s857_s9] sm:$0xff] %v556_v6 }
 0x233   :  { %562 = vsyncpa [#allocation3], 1 }
 0x234   :  { %563 = vsyncpa [#allocation5], 1 }
 0x235   :  { %564 = vsyncpa [#allocation8], 1 }
 0x236   :  { %565 = vsyncpa [#allocation11], 1 }

</bundles_post_ra>
